<compile_context>
chip_gen: v7x
topology: tpu7x:2x2x1
jax: 0.10.0
libtpu: 0.0.40
codegen_flags: <defaults>
</compile_context>

<pallas_src>
import functools

import numpy as np
import jax
import jax.numpy as jnp
from jax import lax
from jax.experimental import pallas as pl
from jax.experimental.pallas import tpu as pltpu


def _round_up(v, m):
    return ((v + m - 1) // m) * m


def _is_pow2(v):
    return v > 0 and (v & (v - 1)) == 0


def _dense_grid_kernel(pts_ref, *refs, lods, feature_dim):
    n_lods = len(lods)
    grid_refs = refs[:n_lods]
    sel_refs = refs[n_lods:2 * n_lods]
    out_ref = refs[2 * n_lods]

    tn = pts_ref.shape[1]
    f = feature_dim

    pts = pts_ref[...]                       # (2, TN) f32, points on lanes
    px = pts[0:1, :]                         # (1, TN)
    py = pts[1:2, :]

    # Shared sublane iota: built once per tile at max width, sliced per LOD.
    max_k = max(max(_round_up(r, 8) for r in lods),
                max(r * f for r in lods))
    iota_s = lax.broadcasted_iota(jnp.int32, (max_k, tn), 0)
    gidx_s = None
    if _is_pow2(f):
        gidx_s = jnp.right_shift(iota_s, int(np.log2(f)))   # row -> x index

    zero = jnp.float32(0.0)
    acc = None
    for l, res in enumerate(lods):           # static (unrolled) loop over LODs
        res_k = _round_up(res, 8)
        rf = res * f

        x = px * (res - 1)                   # (1, TN)
        y = py * (res - 1)
        x1 = jnp.floor(jnp.clip(x, 0.0, res - 1 - 1e-05)).astype(jnp.int32)
        y1 = jnp.floor(jnp.clip(y, 0.0, res - 1 - 1e-05)).astype(jnp.int32)
        x2 = jnp.clip(x1 + 1, 0, res - 1)
        y2 = jnp.clip(y1 + 1, 0, res - 1)
        wxl = x2.astype(jnp.float32) - x     # per-axis corner weights (1, TN)
        wxr = x - x1.astype(jnp.float32)
        wyl = y2.astype(jnp.float32) - y
        wyr = y - y1.astype(jnp.float32)

        # WyT[y, n]: one-hot y weights, (res_k, TN), lane-dense.
        iota_y = iota_s[:res_k]
        wy = (jnp.where(iota_y == y1, wyl, zero)
              + jnp.where(iota_y == y2, wyr, zero))

        # T[x*F + f, n] = sum_y gridT[x*F + f, y] * WyT[y, n]          (MXU)
        t = jnp.dot(grid_refs[l][...], wy,
                    preferred_element_type=jnp.float32)       # (rf, TN)

        # WxT[x*F + f, n] = Wx[n, x]  (x weights broadcast over feature rows)
        if gidx_s is not None:
            gx = gidx_s[:rf]
            wx = (jnp.where(gx == x1, wxl, zero)
                  + jnp.where(gx == x2, wxr, zero))
        else:
            iota_x = iota_s[:rf]
            lo0 = x1 * f
            hi0 = x2 * f
            wx = (jnp.where((iota_x >= lo0) & (iota_x < lo0 + f), wxl, zero)
                  + jnp.where((iota_x >= hi0) & (iota_x < hi0 + f), wxr, zero))

        # Fold the x-sum and this LOD's output-row offset in one MXU op.
        part = jnp.dot(sel_refs[l][...], wx * t,
                       preferred_element_type=jnp.float32)    # (F_pad, TN)
        acc = part if acc is None else acc + part

    out_ref[...] = acc


def dense_grid_forward(points, code_book, lods, tile_n=1024):
    """points: (N, 2) f32 in [0,1]; code_book: list of (res*res, F) f32."""
    n = points.shape[0]
    n_lods = len(lods)
    f = code_book[0].shape[1]
    f_total = f * n_lods
    f_pad = _round_up(f_total, 8)            # padded output rows (sublanes)

    # --- choose point tile (lane) size --------------------------------------
    n_al = _round_up(max(n, 1), 128)
    tn = min(_round_up(tile_n, 128), n_al)
    # Prefer >= 2 balanced grid steps (v7x megacore) when it costs no padding.
    if n_al <= tn and n_al >= 256 and (n_al // 128) % 2 == 0:
        tn = n_al // 2
    n_pad = _round_up(n_al, tn)

    pts_t = jnp.transpose(points.astype(jnp.float32))          # (2, N)
    if n_pad != n:
        pts_t = jnp.pad(pts_t, ((0, 0), (0, n_pad - n)))

    grid_ts = []
    sels = []
    for l, (res, g) in enumerate(zip(lods, code_book)):
        res_k = _round_up(res, 8)
        # gridT[x*F + f, y] = code_book[y*res + x, f]; y padded to res_k (zeros).
        g3 = jnp.asarray(g, jnp.float32).reshape(res, res, f)  # (y, x, f)
        gt = jnp.transpose(g3, (1, 2, 0)).reshape(res * f, res)
        if res_k != res:
            gt = jnp.pad(gt, ((0, 0), (0, res_k - res)))
        grid_ts.append(gt)
        # Constant 0/1 selector: sums over x and places this LOD's features at
        # output rows [l*F, (l+1)*F).
        sel = np.zeros((f_pad, res * f), np.float32)
        k = np.arange(res * f)
        sel[l * f + (k % f), k] = 1.0
        sels.append(jnp.asarray(sel))

    in_specs = [pl.BlockSpec((2, tn), lambda i: (0, i))]
    for res in lods:
        res_k = _round_up(res, 8)
        in_specs.append(pl.BlockSpec((res * f, res_k), lambda i: (0, 0)))
    for res in lods:
        in_specs.append(pl.BlockSpec((f_pad, res * f), lambda i: (0, 0)))

    kernel = functools.partial(_dense_grid_kernel, lods=tuple(lods),
                               feature_dim=f)
    out_t = pl.pallas_call(
        kernel,
        out_shape=jax.ShapeDtypeStruct((f_pad, n_pad), jnp.float32),
        grid=(n_pad // tn,),
        in_specs=in_specs,
        out_specs=pl.BlockSpec((f_pad, tn), lambda i: (0, i)),
        compiler_params=pltpu.CompilerParams(
            dimension_semantics=("parallel",),
            vmem_limit_bytes=32 * 1024 * 1024,
        ),
    )(pts_t, *grid_ts, *sels)

    # Cheap XLA-side transpose back to (N, F_total) and strip padding.
    return jnp.transpose(out_t)[:n, :f_total]


# ------------------------- pure-JAX reference (for checking) -----------------
def _ref_bilinear(res, grid, points):
    x = points[:, 0] * (res - 1)
    y = points[:, 1] * (res - 1)
    x1 = jnp.floor(jnp.clip(x, 0, res - 1 - 1e-05)).astype(jnp.int32)
    y1 = jnp.floor(jnp.clip(y, 0, res - 1 - 1e-05)).astype(jnp.int32)
    x2 = jnp.clip(x1 + 1, 0, res - 1)
    y2 = jnp.clip(y1 + 1, 0, res - 1)
    w1 = (x2 - x) * (y2 - y)
    w2 = (x - x1) * (y2 - y)
    w3 = (x2 - x) * (y - y1)
    w4 = (x - x1) * (y - y1)
    id1 = x1 + y1 * res
    id2 = y1 * res + x2
    id3 = y2 * res + x1
    id4 = y2 * res + x2
    return (w1[:, None] * grid[id1] + w2[:, None] * grid[id2]
            + w3[:, None] * grid[id3] + w4[:, None] * grid[id4])


def _ref_forward(points, code_book, lods):
    return jnp.concatenate(
        [_ref_bilinear(res, g, points) for res, g in zip(lods, code_book)],
        axis=-1)


if __name__ == "__main__":
    base_lod, num_lods, feature_dim = 2, 3, 4
    lods = [2 ** L for L in range(base_lod, base_lod + num_lods)]   # [4, 8, 16]

    key = jax.random.PRNGKey(0)
    k_pts, *k_grids = jax.random.split(key, 1 + num_lods)

    # deterministic "nn.init.normal_(std=0.1)" style init of the code book
    code_book = [
        (0.1 * jax.random.normal(k, (res * res, feature_dim))).astype(jnp.float32)
        for k, res in zip(k_grids, lods)
    ]

    N = 64
    points = jax.random.uniform(k_pts, (N, 2), dtype=jnp.float32)

    out = dense_grid_forward(points, code_book, lods)
    out = jax.block_until_ready(out)

    ref = jax.block_until_ready(_ref_forward(points, code_book, lods))
    assert out.shape == (N, feature_dim * num_lods)
    np.testing.assert_allclose(np.asarray(out), np.asarray(ref),
                               rtol=1e-5, atol=2e-5)

    print("KERNEL_OK")
</pallas_src>

<mosaic_0001>
module attributes {stable_mosaic.version = 11 : i64} {
  func.func @_dense_grid_kernel(%arg0: i32, %arg1: memref<2x128xf32, #tpu.memory_space<vmem>>, %arg2: memref<16x8xf32, #tpu.memory_space<vmem>>, %arg3: memref<32x8xf32, #tpu.memory_space<vmem>>, %arg4: memref<64x16xf32, #tpu.memory_space<vmem>>, %arg5: memref<16x16xf32, #tpu.memory_space<vmem>>, %arg6: memref<16x32xf32, #tpu.memory_space<vmem>>, %arg7: memref<16x64xf32, #tpu.memory_space<vmem>>, %arg8: memref<16x128xf32, #tpu.memory_space<vmem>>) attributes {dimension_semantics = [#tpu.dimension_semantics<parallel>], iteration_bounds = array<i64: 1>, scalar_prefetch = 0 : i64, scratch_operands = 0 : i64, tpu.core_type = #tpu.core_type<tc>, window_params = [{transform_indices = @transform_0, window_bounds = array<i64: 2, 128>}, {pipeline_mode = #tpu.pipeline_mode<synchronous>, transform_indices = @transform_1, window_bounds = array<i64: 16, 8>}, {pipeline_mode = #tpu.pipeline_mode<synchronous>, transform_indices = @transform_2, window_bounds = array<i64: 32, 8>}, {pipeline_mode = #tpu.pipeline_mode<synchronous>, transform_indices = @transform_3, window_bounds = array<i64: 64, 16>}, {pipeline_mode = #tpu.pipeline_mode<synchronous>, transform_indices = @transform_4, window_bounds = array<i64: 16, 16>}, {pipeline_mode = #tpu.pipeline_mode<synchronous>, transform_indices = @transform_5, window_bounds = array<i64: 16, 32>}, {pipeline_mode = #tpu.pipeline_mode<synchronous>, transform_indices = @transform_6, window_bounds = array<i64: 16, 64>}, {transform_indices = @transform_7, window_bounds = array<i64: 16, 128>}]} {
    %c0 = arith.constant 0 : index
    %c0_0 = arith.constant 0 : index
    %0 = vector.load %arg1[%c0, %c0_0] : memref<2x128xf32, #tpu.memory_space<vmem>>, vector<2x128xf32>
    %1 = vector.extract_strided_slice %0 {offsets = [0, 0], sizes = [1, 128], strides = [1, 1]} : vector<2x128xf32> to vector<1x128xf32>
    %2 = vector.extract_strided_slice %0 {offsets = [1, 0], sizes = [1, 128], strides = [1, 1]} : vector<2x128xf32> to vector<1x128xf32>
    %3 = tpu.iota {dimensions = array<i32: 0>} : vector<64x128xi32>
    %c2_i32 = arith.constant 2 : i32
    %4 = vector.broadcast %c2_i32 : i32 to vector<64x128xi32>
    %5 = arith.shrsi %3, %4 : vector<64x128xi32>
    %cst = arith.constant 3.000000e+00 : f32
    %6 = vector.broadcast %cst : f32 to vector<1x128xf32>
    %7 = arith.mulf %1, %6 : vector<1x128xf32>
    %cst_1 = arith.constant 3.000000e+00 : f32
    %8 = vector.broadcast %cst_1 : f32 to vector<1x128xf32>
    %9 = arith.mulf %2, %8 : vector<1x128xf32>
    %cst_2 = arith.constant 0.000000e+00 : f32
    %cst_3 = arith.constant 2.999990e+00 : f32
    %10 = vector.broadcast %cst_2 : f32 to vector<1x128xf32>
    %11 = arith.maximumf %10, %7 : vector<1x128xf32>
    %12 = vector.broadcast %cst_3 : f32 to vector<1x128xf32>
    %13 = arith.minimumf %12, %11 : vector<1x128xf32>
    %14 = math.floor %13 : vector<1x128xf32>
    %15 = arith.fptosi %14 : vector<1x128xf32> to vector<1x128xi32>
    %cst_4 = arith.constant 0.000000e+00 : f32
    %cst_5 = arith.constant 2.999990e+00 : f32
    %16 = vector.broadcast %cst_4 : f32 to vector<1x128xf32>
    %17 = arith.maximumf %16, %9 : vector<1x128xf32>
    %18 = vector.broadcast %cst_5 : f32 to vector<1x128xf32>
    %19 = arith.minimumf %18, %17 : vector<1x128xf32>
    %20 = math.floor %19 : vector<1x128xf32>
    %21 = arith.fptosi %20 : vector<1x128xf32> to vector<1x128xi32>
    %c1_i32 = arith.constant 1 : i32
    %22 = vector.broadcast %c1_i32 : i32 to vector<1x128xi32>
    %23 = arith.addi %15, %22 : vector<1x128xi32>
    %c0_i32 = arith.constant 0 : i32
    %c3_i32 = arith.constant 3 : i32
    %24 = vector.broadcast %c0_i32 : i32 to vector<1x128xi32>
    %25 = arith.maxsi %24, %23 : vector<1x128xi32>
    %26 = vector.broadcast %c3_i32 : i32 to vector<1x128xi32>
    %27 = arith.minsi %26, %25 : vector<1x128xi32>
    %c1_i32_6 = arith.constant 1 : i32
    %28 = vector.broadcast %c1_i32_6 : i32 to vector<1x128xi32>
    %29 = arith.addi %21, %28 : vector<1x128xi32>
    %c0_i32_7 = arith.constant 0 : i32
    %c3_i32_8 = arith.constant 3 : i32
    %30 = vector.broadcast %c0_i32_7 : i32 to vector<1x128xi32>
    %31 = arith.maxsi %30, %29 : vector<1x128xi32>
    %32 = vector.broadcast %c3_i32_8 : i32 to vector<1x128xi32>
    %33 = arith.minsi %32, %31 : vector<1x128xi32>
    %34 = arith.sitofp %27 : vector<1x128xi32> to vector<1x128xf32>
    %35 = arith.subf %34, %7 : vector<1x128xf32>
    %36 = arith.sitofp %15 : vector<1x128xi32> to vector<1x128xf32>
    %37 = arith.subf %7, %36 : vector<1x128xf32>
    %38 = arith.sitofp %33 : vector<1x128xi32> to vector<1x128xf32>
    %39 = arith.subf %38, %9 : vector<1x128xf32>
    %40 = arith.sitofp %21 : vector<1x128xi32> to vector<1x128xf32>
    %41 = arith.subf %9, %40 : vector<1x128xf32>
    %42 = vector.extract_strided_slice %3 {offsets = [0, 0], sizes = [8, 128], strides = [1, 1]} : vector<64x128xi32> to vector<8x128xi32>
    %43 = vector.broadcast %21 : vector<1x128xi32> to vector<8x128xi32>
    %44 = arith.cmpi eq, %42, %43 : vector<8x128xi32>
    %cst_9 = arith.constant 0.000000e+00 : f32
    %45 = vector.shape_cast %39 : vector<1x128xf32> to vector<1x128xf32>
    %46 = vector.broadcast %45 : vector<1x128xf32> to vector<8x128xf32>
    %47 = vector.broadcast %cst_9 : f32 to vector<8x128xf32>
    %48 = arith.select %44, %46, %47 : vector<8x128xi1>, vector<8x128xf32>
    %49 = vector.broadcast %33 : vector<1x128xi32> to vector<8x128xi32>
    %50 = arith.cmpi eq, %42, %49 : vector<8x128xi32>
    %cst_10 = arith.constant 0.000000e+00 : f32
    %51 = vector.shape_cast %41 : vector<1x128xf32> to vector<1x128xf32>
    %52 = vector.broadcast %51 : vector<1x128xf32> to vector<8x128xf32>
    %53 = vector.broadcast %cst_10 : f32 to vector<8x128xf32>
    %54 = arith.select %50, %52, %53 : vector<8x128xi1>, vector<8x128xf32>
    %55 = arith.addf %48, %54 : vector<8x128xf32>
    %c0_11 = arith.constant 0 : index
    %c0_12 = arith.constant 0 : index
    %56 = vector.load %arg2[%c0_11, %c0_12] : memref<16x8xf32, #tpu.memory_space<vmem>>, vector<16x8xf32>
    %cst_13 = arith.constant dense<0.000000e+00> : vector<16x128xf32>
    %57 = tpu.matmul %56, %55, %cst_13 {dimension_numbers = #tpu.dot_dimension_numbers<[1], [0], [0], [1], [0, 0, 1, 1], [], []>} : vector<16x8xf32>, vector<8x128xf32>, vector<16x128xf32> -> vector<16x128xf32>
    %58 = vector.extract_strided_slice %5 {offsets = [0, 0], sizes = [16, 128], strides = [1, 1]} : vector<64x128xi32> to vector<16x128xi32>
    %59 = vector.broadcast %15 : vector<1x128xi32> to vector<16x128xi32>
    %60 = arith.cmpi eq, %58, %59 : vector<16x128xi32>
    %cst_14 = arith.constant 0.000000e+00 : f32
    %61 = vector.shape_cast %35 : vector<1x128xf32> to vector<1x128xf32>
    %62 = vector.broadcast %61 : vector<1x128xf32> to vector<16x128xf32>
    %63 = vector.broadcast %cst_14 : f32 to vector<16x128xf32>
    %64 = arith.select %60, %62, %63 : vector<16x128xi1>, vector<16x128xf32>
    %65 = vector.broadcast %27 : vector<1x128xi32> to vector<16x128xi32>
    %66 = arith.cmpi eq, %58, %65 : vector<16x128xi32>
    %cst_15 = arith.constant 0.000000e+00 : f32
    %67 = vector.shape_cast %37 : vector<1x128xf32> to vector<1x128xf32>
    %68 = vector.broadcast %67 : vector<1x128xf32> to vector<16x128xf32>
    %69 = vector.broadcast %cst_15 : f32 to vector<16x128xf32>
    %70 = arith.select %66, %68, %69 : vector<16x128xi1>, vector<16x128xf32>
    %71 = arith.addf %64, %70 : vector<16x128xf32>
    %c0_16 = arith.constant 0 : index
    %c0_17 = arith.constant 0 : index
    %72 = vector.load %arg5[%c0_16, %c0_17] : memref<16x16xf32, #tpu.memory_space<vmem>>, vector<16x16xf32>
    %73 = arith.mulf %71, %57 : vector<16x128xf32>
    %cst_18 = arith.constant dense<0.000000e+00> : vector<16x128xf32>
    %74 = tpu.matmul %72, %73, %cst_18 {dimension_numbers = #tpu.dot_dimension_numbers<[1], [0], [0], [1], [0, 0, 1, 1], [], []>} : vector<16x16xf32>, vector<16x128xf32>, vector<16x128xf32> -> vector<16x128xf32>
    %cst_19 = arith.constant 7.000000e+00 : f32
    %75 = vector.broadcast %cst_19 : f32 to vector<1x128xf32>
    %76 = arith.mulf %1, %75 : vector<1x128xf32>
    %cst_20 = arith.constant 7.000000e+00 : f32
    %77 = vector.broadcast %cst_20 : f32 to vector<1x128xf32>
    %78 = arith.mulf %2, %77 : vector<1x128xf32>
    %cst_21 = arith.constant 0.000000e+00 : f32
    %cst_22 = arith.constant 6.999990e+00 : f32
    %79 = vector.broadcast %cst_21 : f32 to vector<1x128xf32>
    %80 = arith.maximumf %79, %76 : vector<1x128xf32>
    %81 = vector.broadcast %cst_22 : f32 to vector<1x128xf32>
    %82 = arith.minimumf %81, %80 : vector<1x128xf32>
    %83 = math.floor %82 : vector<1x128xf32>
    %84 = arith.fptosi %83 : vector<1x128xf32> to vector<1x128xi32>
    %cst_23 = arith.constant 0.000000e+00 : f32
    %cst_24 = arith.constant 6.999990e+00 : f32
    %85 = vector.broadcast %cst_23 : f32 to vector<1x128xf32>
    %86 = arith.maximumf %85, %78 : vector<1x128xf32>
    %87 = vector.broadcast %cst_24 : f32 to vector<1x128xf32>
    %88 = arith.minimumf %87, %86 : vector<1x128xf32>
    %89 = math.floor %88 : vector<1x128xf32>
    %90 = arith.fptosi %89 : vector<1x128xf32> to vector<1x128xi32>
    %c1_i32_25 = arith.constant 1 : i32
    %91 = vector.broadcast %c1_i32_25 : i32 to vector<1x128xi32>
    %92 = arith.addi %84, %91 : vector<1x128xi32>
    %c0_i32_26 = arith.constant 0 : i32
    %c7_i32 = arith.constant 7 : i32
    %93 = vector.broadcast %c0_i32_26 : i32 to vector<1x128xi32>
    %94 = arith.maxsi %93, %92 : vector<1x128xi32>
    %95 = vector.broadcast %c7_i32 : i32 to vector<1x128xi32>
    %96 = arith.minsi %95, %94 : vector<1x128xi32>
    %c1_i32_27 = arith.constant 1 : i32
    %97 = vector.broadcast %c1_i32_27 : i32 to vector<1x128xi32>
    %98 = arith.addi %90, %97 : vector<1x128xi32>
    %c0_i32_28 = arith.constant 0 : i32
    %c7_i32_29 = arith.constant 7 : i32
    %99 = vector.broadcast %c0_i32_28 : i32 to vector<1x128xi32>
    %100 = arith.maxsi %99, %98 : vector<1x128xi32>
    %101 = vector.broadcast %c7_i32_29 : i32 to vector<1x128xi32>
    %102 = arith.minsi %101, %100 : vector<1x128xi32>
    %103 = arith.sitofp %96 : vector<1x128xi32> to vector<1x128xf32>
    %104 = arith.subf %103, %76 : vector<1x128xf32>
    %105 = arith.sitofp %84 : vector<1x128xi32> to vector<1x128xf32>
    %106 = arith.subf %76, %105 : vector<1x128xf32>
    %107 = arith.sitofp %102 : vector<1x128xi32> to vector<1x128xf32>
    %108 = arith.subf %107, %78 : vector<1x128xf32>
    %109 = arith.sitofp %90 : vector<1x128xi32> to vector<1x128xf32>
    %110 = arith.subf %78, %109 : vector<1x128xf32>
    %111 = vector.extract_strided_slice %3 {offsets = [0, 0], sizes = [8, 128], strides = [1, 1]} : vector<64x128xi32> to vector<8x128xi32>
    %112 = vector.broadcast %90 : vector<1x128xi32> to vector<8x128xi32>
    %113 = arith.cmpi eq, %111, %112 : vector<8x128xi32>
    %cst_30 = arith.constant 0.000000e+00 : f32
    %114 = vector.shape_cast %108 : vector<1x128xf32> to vector<1x128xf32>
    %115 = vector.broadcast %114 : vector<1x128xf32> to vector<8x128xf32>
    %116 = vector.broadcast %cst_30 : f32 to vector<8x128xf32>
    %117 = arith.select %113, %115, %116 : vector<8x128xi1>, vector<8x128xf32>
    %118 = vector.broadcast %102 : vector<1x128xi32> to vector<8x128xi32>
    %119 = arith.cmpi eq, %111, %118 : vector<8x128xi32>
    %cst_31 = arith.constant 0.000000e+00 : f32
    %120 = vector.shape_cast %110 : vector<1x128xf32> to vector<1x128xf32>
    %121 = vector.broadcast %120 : vector<1x128xf32> to vector<8x128xf32>
    %122 = vector.broadcast %cst_31 : f32 to vector<8x128xf32>
    %123 = arith.select %119, %121, %122 : vector<8x128xi1>, vector<8x128xf32>
    %124 = arith.addf %117, %123 : vector<8x128xf32>
    %c0_32 = arith.constant 0 : index
    %c0_33 = arith.constant 0 : index
    %125 = vector.load %arg3[%c0_32, %c0_33] : memref<32x8xf32, #tpu.memory_space<vmem>>, vector<32x8xf32>
    %cst_34 = arith.constant dense<0.000000e+00> : vector<32x128xf32>
    %126 = tpu.matmul %125, %124, %cst_34 {dimension_numbers = #tpu.dot_dimension_numbers<[1], [0], [0], [1], [0, 0, 1, 1], [], []>} : vector<32x8xf32>, vector<8x128xf32>, vector<32x128xf32> -> vector<32x128xf32>
    %127 = vector.extract_strided_slice %5 {offsets = [0, 0], sizes = [32, 128], strides = [1, 1]} : vector<64x128xi32> to vector<32x128xi32>
    %128 = vector.broadcast %84 : vector<1x128xi32> to vector<32x128xi32>
    %129 = arith.cmpi eq, %127, %128 : vector<32x128xi32>
    %cst_35 = arith.constant 0.000000e+00 : f32
    %130 = vector.shape_cast %104 : vector<1x128xf32> to vector<1x128xf32>
    %131 = vector.broadcast %130 : vector<1x128xf32> to vector<32x128xf32>
    %132 = vector.broadcast %cst_35 : f32 to vector<32x128xf32>
    %133 = arith.select %129, %131, %132 : vector<32x128xi1>, vector<32x128xf32>
    %134 = vector.broadcast %96 : vector<1x128xi32> to vector<32x128xi32>
    %135 = arith.cmpi eq, %127, %134 : vector<32x128xi32>
    %cst_36 = arith.constant 0.000000e+00 : f32
    %136 = vector.shape_cast %106 : vector<1x128xf32> to vector<1x128xf32>
    %137 = vector.broadcast %136 : vector<1x128xf32> to vector<32x128xf32>
    %138 = vector.broadcast %cst_36 : f32 to vector<32x128xf32>
    %139 = arith.select %135, %137, %138 : vector<32x128xi1>, vector<32x128xf32>
    %140 = arith.addf %133, %139 : vector<32x128xf32>
    %c0_37 = arith.constant 0 : index
    %c0_38 = arith.constant 0 : index
    %141 = vector.load %arg6[%c0_37, %c0_38] : memref<16x32xf32, #tpu.memory_space<vmem>>, vector<16x32xf32>
    %142 = arith.mulf %140, %126 : vector<32x128xf32>
    %cst_39 = arith.constant dense<0.000000e+00> : vector<16x128xf32>
    %143 = tpu.matmul %141, %142, %cst_39 {dimension_numbers = #tpu.dot_dimension_numbers<[1], [0], [0], [1], [0, 0, 1, 1], [], []>} : vector<16x32xf32>, vector<32x128xf32>, vector<16x128xf32> -> vector<16x128xf32>
    %144 = arith.addf %74, %143 : vector<16x128xf32>
    %cst_40 = arith.constant 1.500000e+01 : f32
    %145 = vector.broadcast %cst_40 : f32 to vector<1x128xf32>
    %146 = arith.mulf %1, %145 : vector<1x128xf32>
    %cst_41 = arith.constant 1.500000e+01 : f32
    %147 = vector.broadcast %cst_41 : f32 to vector<1x128xf32>
    %148 = arith.mulf %2, %147 : vector<1x128xf32>
    %cst_42 = arith.constant 0.000000e+00 : f32
    %cst_43 = arith.constant 14.9999905 : f32
    %149 = vector.broadcast %cst_42 : f32 to vector<1x128xf32>
    %150 = arith.maximumf %149, %146 : vector<1x128xf32>
    %151 = vector.broadcast %cst_43 : f32 to vector<1x128xf32>
    %152 = arith.minimumf %151, %150 : vector<1x128xf32>
    %153 = math.floor %152 : vector<1x128xf32>
    %154 = arith.fptosi %153 : vector<1x128xf32> to vector<1x128xi32>
    %cst_44 = arith.constant 0.000000e+00 : f32
    %cst_45 = arith.constant 14.9999905 : f32
    %155 = vector.broadcast %cst_44 : f32 to vector<1x128xf32>
    %156 = arith.maximumf %155, %148 : vector<1x128xf32>
    %157 = vector.broadcast %cst_45 : f32 to vector<1x128xf32>
    %158 = arith.minimumf %157, %156 : vector<1x128xf32>
    %159 = math.floor %158 : vector<1x128xf32>
    %160 = arith.fptosi %159 : vector<1x128xf32> to vector<1x128xi32>
    %c1_i32_46 = arith.constant 1 : i32
    %161 = vector.broadcast %c1_i32_46 : i32 to vector<1x128xi32>
    %162 = arith.addi %154, %161 : vector<1x128xi32>
    %c0_i32_47 = arith.constant 0 : i32
    %c15_i32 = arith.constant 15 : i32
    %163 = vector.broadcast %c0_i32_47 : i32 to vector<1x128xi32>
    %164 = arith.maxsi %163, %162 : vector<1x128xi32>
    %165 = vector.broadcast %c15_i32 : i32 to vector<1x128xi32>
    %166 = arith.minsi %165, %164 : vector<1x128xi32>
    %c1_i32_48 = arith.constant 1 : i32
    %167 = vector.broadcast %c1_i32_48 : i32 to vector<1x128xi32>
    %168 = arith.addi %160, %167 : vector<1x128xi32>
    %c0_i32_49 = arith.constant 0 : i32
    %c15_i32_50 = arith.constant 15 : i32
    %169 = vector.broadcast %c0_i32_49 : i32 to vector<1x128xi32>
    %170 = arith.maxsi %169, %168 : vector<1x128xi32>
    %171 = vector.broadcast %c15_i32_50 : i32 to vector<1x128xi32>
    %172 = arith.minsi %171, %170 : vector<1x128xi32>
    %173 = arith.sitofp %166 : vector<1x128xi32> to vector<1x128xf32>
    %174 = arith.subf %173, %146 : vector<1x128xf32>
    %175 = arith.sitofp %154 : vector<1x128xi32> to vector<1x128xf32>
    %176 = arith.subf %146, %175 : vector<1x128xf32>
    %177 = arith.sitofp %172 : vector<1x128xi32> to vector<1x128xf32>
    %178 = arith.subf %177, %148 : vector<1x128xf32>
    %179 = arith.sitofp %160 : vector<1x128xi32> to vector<1x128xf32>
    %180 = arith.subf %148, %179 : vector<1x128xf32>
    %181 = vector.extract_strided_slice %3 {offsets = [0, 0], sizes = [16, 128], strides = [1, 1]} : vector<64x128xi32> to vector<16x128xi32>
    %182 = vector.broadcast %160 : vector<1x128xi32> to vector<16x128xi32>
    %183 = arith.cmpi eq, %181, %182 : vector<16x128xi32>
    %cst_51 = arith.constant 0.000000e+00 : f32
    %184 = vector.shape_cast %178 : vector<1x128xf32> to vector<1x128xf32>
    %185 = vector.broadcast %184 : vector<1x128xf32> to vector<16x128xf32>
    %186 = vector.broadcast %cst_51 : f32 to vector<16x128xf32>
    %187 = arith.select %183, %185, %186 : vector<16x128xi1>, vector<16x128xf32>
    %188 = vector.broadcast %172 : vector<1x128xi32> to vector<16x128xi32>
    %189 = arith.cmpi eq, %181, %188 : vector<16x128xi32>
    %cst_52 = arith.constant 0.000000e+00 : f32
    %190 = vector.shape_cast %180 : vector<1x128xf32> to vector<1x128xf32>
    %191 = vector.broadcast %190 : vector<1x128xf32> to vector<16x128xf32>
    %192 = vector.broadcast %cst_52 : f32 to vector<16x128xf32>
    %193 = arith.select %189, %191, %192 : vector<16x128xi1>, vector<16x128xf32>
    %194 = arith.addf %187, %193 : vector<16x128xf32>
    %c0_53 = arith.constant 0 : index
    %c0_54 = arith.constant 0 : index
    %195 = vector.load %arg4[%c0_53, %c0_54] : memref<64x16xf32, #tpu.memory_space<vmem>>, vector<64x16xf32>
    %cst_55 = arith.constant dense<0.000000e+00> : vector<64x128xf32>
    %196 = tpu.matmul %195, %194, %cst_55 {dimension_numbers = #tpu.dot_dimension_numbers<[1], [0], [0], [1], [0, 0, 1, 1], [], []>} : vector<64x16xf32>, vector<16x128xf32>, vector<64x128xf32> -> vector<64x128xf32>
    %197 = vector.broadcast %154 : vector<1x128xi32> to vector<64x128xi32>
    %198 = arith.cmpi eq, %5, %197 : vector<64x128xi32>
    %cst_56 = arith.constant 0.000000e+00 : f32
    %199 = vector.shape_cast %174 : vector<1x128xf32> to vector<1x128xf32>
    %200 = vector.broadcast %199 : vector<1x128xf32> to vector<64x128xf32>
    %201 = vector.broadcast %cst_56 : f32 to vector<64x128xf32>
    %202 = arith.select %198, %200, %201 : vector<64x128xi1>, vector<64x128xf32>
    %203 = vector.broadcast %166 : vector<1x128xi32> to vector<64x128xi32>
    %204 = arith.cmpi eq, %5, %203 : vector<64x128xi32>
    %cst_57 = arith.constant 0.000000e+00 : f32
    %205 = vector.shape_cast %176 : vector<1x128xf32> to vector<1x128xf32>
    %206 = vector.broadcast %205 : vector<1x128xf32> to vector<64x128xf32>
    %207 = vector.broadcast %cst_57 : f32 to vector<64x128xf32>
    %208 = arith.select %204, %206, %207 : vector<64x128xi1>, vector<64x128xf32>
    %209 = arith.addf %202, %208 : vector<64x128xf32>
    %c0_58 = arith.constant 0 : index
    %c0_59 = arith.constant 0 : index
    %210 = vector.load %arg7[%c0_58, %c0_59] : memref<16x64xf32, #tpu.memory_space<vmem>>, vector<16x64xf32>
    %211 = arith.mulf %209, %196 : vector<64x128xf32>
    %cst_60 = arith.constant dense<0.000000e+00> : vector<16x128xf32>
    %212 = tpu.matmul %210, %211, %cst_60 {dimension_numbers = #tpu.dot_dimension_numbers<[1], [0], [0], [1], [0, 0, 1, 1], [], []>} : vector<16x64xf32>, vector<64x128xf32>, vector<16x128xf32> -> vector<16x128xf32>
    %213 = arith.addf %144, %212 : vector<16x128xf32>
    %c0_61 = arith.constant 0 : index
    %c0_62 = arith.constant 0 : index
    %214 = vector.load %arg8[%c0_61, %c0_62] : memref<16x128xf32, #tpu.memory_space<vmem>>, vector<16x128xf32>
    tpu.vector_store %arg8[%c0_61, %c0_62], %213 {strides = array<i32>} : memref<16x128xf32, #tpu.memory_space<vmem>>, vector<16x128xf32>,
    return
  }
  func.func @transform_0(%arg0: i32) -> (i32, i32) {
    %c0_i32 = arith.constant 0 : i32
    %c0_i32_0 = arith.constant 0 : i32
    return %c0_i32, %arg0 : i32, i32
  }
  func.func @transform_1(%arg0: i32) -> (i32, i32) {
    %c0_i32 = arith.constant 0 : i32
    %c0_i32_0 = arith.constant 0 : i32
    %c0_i32_1 = arith.constant 0 : i32
    return %c0_i32, %c0_i32_0 : i32, i32
  }
  func.func @transform_2(%arg0: i32) -> (i32, i32) {
    %c0_i32 = arith.constant 0 : i32
    %c0_i32_0 = arith.constant 0 : i32
    %c0_i32_1 = arith.constant 0 : i32
    return %c0_i32, %c0_i32_0 : i32, i32
  }
  func.func @transform_3(%arg0: i32) -> (i32, i32) {
    %c0_i32 = arith.constant 0 : i32
    %c0_i32_0 = arith.constant 0 : i32
    %c0_i32_1 = arith.constant 0 : i32
    return %c0_i32, %c0_i32_0 : i32, i32
  }
  func.func @transform_4(%arg0: i32) -> (i32, i32) {
    %c0_i32 = arith.constant 0 : i32
    %c0_i32_0 = arith.constant 0 : i32
    %c0_i32_1 = arith.constant 0 : i32
    return %c0_i32, %c0_i32_0 : i32, i32
  }
  func.func @transform_5(%arg0: i32) -> (i32, i32) {
    %c0_i32 = arith.constant 0 : i32
    %c0_i32_0 = arith.constant 0 : i32
    %c0_i32_1 = arith.constant 0 : i32
    return %c0_i32, %c0_i32_0 : i32, i32
  }
  func.func @transform_6(%arg0: i32) -> (i32, i32) {
    %c0_i32 = arith.constant 0 : i32
    %c0_i32_0 = arith.constant 0 : i32
    %c0_i32_1 = arith.constant 0 : i32
    return %c0_i32, %c0_i32_0 : i32, i32
  }
  func.func @transform_7(%arg0: i32) -> (i32, i32) {
    %c0_i32 = arith.constant 0 : i32
    %c0_i32_0 = arith.constant 0 : i32
    return %c0_i32, %arg0 : i32, i32
  }
}

</mosaic_0001>

<bundles_post_ra>
// kernel: tpu_custom_call.1
= control target key start
LH: loop header
LB: loop body
LE: loop exit
PB: predicated region body
PF: predicated region fallthrough
CT: control target
= control target key end

     0   :  { %vm82_vm0 = vcmask 64512   ;;  %s1340_s0 = inlined_call_operand.vmem [shape: f32[2,128], index: 0, kind: input, shape index: {}]   ;;  %s1341_s1 = inlined_call_operand.vmem [shape: f32[16,8], index: 1, kind: input, shape index: {}]   ;;  %s1342_s2 = inlined_call_operand.vmem [shape: f32[32,8], index: 2, kind: input, shape index: {}]   ;;  %s1343_s3 = inlined_call_operand.vmem [shape: f32[64,16], index: 3, kind: input, shape index: {}]   ;;  %s1344_s4 = inlined_call_operand.vmem [shape: f32[16,16], index: 4, kind: input, shape index: {}]   ;;  %s1345_s5 = inlined_call_operand.vmem [shape: f32[16,32], index: 5, kind: input, shape index: {}]   ;;  %s1346_s6 = inlined_call_operand.vmem [shape: f32[16,64], index: 6, kind: input, shape index: {}]   ;;  %s1347_s7 = inlined_call_operand.hbm [shape: f32[16,128], index: 7, kind: output, shape index: {}]  }
   0x1   :  { %v1120_v0 = vld [vmem:[%s1340_s0] sm:$0x3] }
   0x2   :  { %v229_v1 = vld [vmem:[%s1342_s2] sm:$0xff]  ;;  %v194_v2 = vmul.f32 7.0, %v1120_v0 }
   0x3   :  { %946 = vmatprep.mubr.msk.f32.mxu1 %vm82_vm0, %v229_v1 }
   0x4   :  { %12 = vsyncpa [#allocation3], 0  ;;  %v195_v3 = vmax.f32 %v194_v2, 0.0  ;;  %v28_v5 = vlaneseq  ;;  %v230_v25 = vld [vmem:[%s1342_s2 + $0x8] sm:$0xff]  ;;  %v231_v26 = vld [vmem:[%s1342_s2 + $0x10] sm:$0xff]  ;;  %v45_v28 = vmul.f32 3.0, %v1120_v0 }
   0x5   :  { %v232_v27 = vld [vmem:[%s1342_s2 + $0x18] sm:$0xff]  ;;  %s1074_s12 = smov [#allocation2]  }
   0x6   :  { %v196_v4 = vmin.f32 %v195_v3, 6.99999  ;;  %v1127_v8 = vshrl.u32 %v28_v5, 7  ;;  %v46_v29 = vmax.f32 %v45_v28, 0.0  ;;  %s870_s13 = sshll.u32 %s1074_s12, 4  ;;  %s871_s13 = int_to_ptr.vmem [resolvable:$true] %s870_s13 }
   0x7   :  { %s1050_s14 = scalar_lea.vmem %s871_s13, 256  ;;  %p1055_p1 = scmp.lt.s32.totalorder %s871_s13, %s871_s13 }
   0x8   :  { %v197_v6 = vfloor.f32 %v196_v4  ;;  %v1130_v12 = vsub.s32 1, %v1127_v8  ;;  %v47_v30 = vmin.f32 %v46_v29, 2.99999  ;;  %v1152_v31 = vsub.s32 0, %v1127_v8  ;;  %p1051_p0 = scmp.ne.s32.totalorder %s871_s13, %s1050_s14  ;;  %p1056_p2 = scmp.lt.s32.totalorder %s1050_s14, %s1050_s14 }
   0x9   :  { %v1155_v32 = vadd.s32 8, %v1127_v8  ;;  %v1168_v42 = vshra.s32 %v1127_v8, 2  ;;  %v32_v43 = vadd.s32 24, %v1127_v8  ;;  %v31_v51 = vadd.s32 16, %v1127_v8 }
   0xa   :  { %v1043_v7 = vtrunc.f32 %v197_v6  ;;  %v48_v33 = vfloor.f32 %v47_v30  ;;  %p1057_p3 = por %p1056_p2, %p1055_p1 }
   0xb   :  { %v1159_v36 = vshra.s32 %v1155_v32, 2  ;;  %v1177_v49 = vshra.s32 %v32_v43, 2  ;;  %v1185_v56 = vshra.s32 %v31_v51, 2 }
   0xc   :  { %v1044_v9 = vcvt.f32.s32 %v1043_v7  ;;  %v1041_v34 = vtrunc.f32 %v48_v33  ;;  %p1058_p4 = pnand %p1057_p3, %p1051_p0 }
   0xe   :  { %v199_v10 = vadd.s32 1, %v1044_v9  ;;  %v206_v11 = vcvt.s32.f32 %v1044_v9  ;;  %v211_v16 = vrot.slane %v1044_v9, %v1130_v12  ;;  %v1161_v37 = vcvt.f32.s32 %v1041_v34 }
   0xf   :  { %v333_v40 = vrot.slane %v1044_v9, %v1152_v31 }
  0x10   :  { %vm200_vm1 = vcmp.gt.s32.totalorder %v199_v10, 0  ;;  %v207_v13 = vsub.f32 %v194_v2, %v206_v11  ;;  %vm212_vm4 = vcmp.eq.s32.totalorder %v1127_v8, %v211_v16  ;;  %v50_v41 = vadd.s32 1, %v1161_v37  ;;  %v81_v11 = vld [vmem:[%s1341_s1 + $0x8] sm:$0xff] }
  0x11   :  { %v201_v14 = vsel %vm200_vm1, %v199_v10, 0  ;;  %vm335_vm5 = vcmp.eq.s32.totalorder %v1159_v36, %v333_v40  ;;  %vm334_vm8 = vcmp.eq.s32.totalorder %v1168_v42, %v333_v40  ;;  %vm337_vm10 = vcmp.eq.s32.totalorder %v1177_v49, %v333_v40  ;;  %v80_v10 = vld [vmem:[%s1341_s1] sm:$0xff] }
  0x12   :  { %vm202_vm2 = vcmp.lt.s32.totalorder %v201_v14, 7  ;;  %v226_v19 = vrot.slane %v207_v13, %v1130_v12  ;;  %v357_v39 = vrot.slane %v207_v13, %v1152_v31  ;;  %vm51_vm7 = vcmp.gt.s32.totalorder %v50_v41, 0  ;;  %941 = vmatprep.mubr.msk.f32.mxu0 %vm82_vm0, %v80_v10  ;;  %v366_v13 = vld [vmem:[%s1345_s5] sm:$0xff] }
  0x13   :  { %v203_v15 = vsel %vm202_vm2, %v201_v14, 7  ;;  %v52_v52 = vsel %vm51_vm7, %v50_v41, 0  ;;  %v57_v53 = vcvt.s32.f32 %v1161_v37  ;;  %vm336_vm13 = vcmp.eq.s32.totalorder %v1185_v56, %v333_v40 }
  0x14   :  { %v204_v17 = vcvt.s32.f32 %v203_v15  ;;  %v221_v18 = vrot.slane %v203_v15, %v1130_v12  ;;  %v349_v35 = vrot.slane %v203_v15, %v1152_v31  ;;  %vm53_vm12 = vcmp.lt.s32.totalorder %v52_v52, 3 }
  0x15   :  { %v1187_v57 = vsel %vm53_vm12, %v52_v52, 3  ;;  %v1190_v60 = vsub.f32 %v45_v28, %v57_v53  ;;  %v62_v61 = vrot.slane %v1161_v37, %v1130_v12  ;;  %vm372_vm2 = vcmask 261120   ;;  %v577_v53 = vld [vmem:[%s1343_s3 + $0x8] sm:$0xff] }
  0x16   :  { %v205_v20 = vsub.f32 %v204_v17, %v194_v2  ;;  %vm222_vm3 = vcmp.eq.s32.totalorder %v1127_v8, %v221_v18  ;;  %vm351_vm6 = vcmp.eq.s32.totalorder %v1159_v36, %v349_v35  ;;  %vm350_vm9 = vcmp.eq.s32.totalorder %v1168_v42, %v349_v35 }
  0x17   :  { %v227_v22 = vsel %vm222_vm3, %v226_v19, 0.0  ;;  %v359_v45 = vsel %vm351_vm6, %v357_v39, 0.0  ;;  %v358_v48 = vsel %vm350_vm9, %v357_v39, 0.0  ;;  %vm353_vm11 = vcmp.eq.s32.totalorder %v1177_v49, %v349_v35 }
  0x18   :  { %v216_v21 = vrot.slane %v205_v20, %v1130_v12  ;;  %v341_v38 = vrot.slane %v205_v20, %v1152_v31  ;;  %v361_v55 = vsel %vm353_vm11, %v357_v39, 0.0  ;;  %v55_v59 = vcvt.s32.f32 %v1187_v57 }
  0x19   :  { %vm352_vm14 = vcmp.eq.s32.totalorder %v1185_v56, %v349_v35  ;;  %v72_v62 = vrot.slane %v1187_v57, %v1130_v12  ;;  %v77_v3 = vrot.slane %v1190_v60, %v1130_v12  ;;  %vm63_vm15 = vcmp.eq.s32.totalorder %v1127_v8, %v62_v61  ;;  %v582_v61 = vld [vmem:[%s1343_s3 + $0x30] sm:$0xff] }
  0x1a   :  { %v217_v23 = vsel %vm212_vm4, %v216_v21, 0.0  ;;  %v343_v44 = vsel %vm335_vm5, %v341_v38, 0.0  ;;  %v342_v47 = vsel %vm334_vm8, %v341_v38, 0.0  ;;  %v345_v54 = vsel %vm337_vm10, %v341_v38, 0.0 }
  0x1b   :  { %v228_v24 = vadd.f32 %v227_v22, %v217_v23  ;;  %v1175_v46 = vadd.f32 %v359_v45, %v343_v44  ;;  %v1179_v50 = vadd.f32 %v358_v48, %v342_v47  ;;  %v365_v58 = vadd.f32 %v361_v55, %v345_v54  ;;  %v578_v54 = vld [vmem:[%s1343_s3 + $0x10] sm:$0xff]  ;;  %v579_v55 = vld [vmem:[%s1343_s3 + $0x18] sm:$0xff] }
  0x1c   :  { %v344_v63 = vsel %vm336_vm13, %v341_v38, 0.0  ;;  %v360_v1 = vsel %vm352_vm14, %v357_v39, 0.0  ;;  %v1198_v2 = vsub.f32 %v55_v59, %v45_v28  ;;  %vm73_vm1 = vcmp.eq.s32.totalorder %v1127_v8, %v72_v62  ;;  %v581_v59 = vld [vmem:[%s1343_s3 + $0x28] sm:$0xff]  ;;  %v583_v62 = vld [vmem:[%s1343_s3 + $0x38] sm:$0xff] }
  0x1d   :  { %944 = vmatprep.subr.mxu1 %v228_v24  ;;  %v364_v4 = vadd.f32 %v360_v1, %v344_v63  ;;  %v78_v6 = vsel %vm73_vm1, %v77_v3, 0.0  ;;  %v536_v14 = vmul.f32 15.0, %v1120_v0  ;;  %vm454_vm8 = vcmask 130048  }
  0x1e   :  { %945 = vmatpush3.msra.mxu1 %v228_v24  ;;  %v67_v5 = vrot.slane %v1198_v2, %v1130_v12  ;;  %v167_v63 = vrot.slane %v1161_v37, %v1152_v31  ;;  %v179_v1 = vrot.slane %v1187_v57, %v1152_v31  ;;  %v173_v3 = vrot.slane %v1198_v2, %v1152_v31 }
  0x1f   :  { %947 = vmatmul.mubr.msk.f32.vlgmr.msra.gmra.mrb[0].mxu1 %vm82_vm0, %v230_v25  ;;  %v537_v15 = vmax.f32 %v536_v14, 0.0 }
  0x20   :  { %949 = vmatprep.mubr.msk.f32.mxu1 %vm82_vm0, %v231_v26  ;;  %v68_v7 = vsel %vm63_vm15, %v67_v5, 0.0  ;;  %vm169_vm9 = vcmp.eq.s32.totalorder %v1159_v36, %v167_v63  ;;  %vm181_vm10 = vcmp.eq.s32.totalorder %v1159_v36, %v179_v1  ;;  %vm168_vm11 = vcmp.eq.s32.totalorder %v1168_v42, %v167_v63 }
  0x21   :  { %v79_v9 = vadd.f32 %v78_v6, %v68_v7  ;;  %v538_v16 = vmin.f32 %v537_v15, 14.99999  ;;  %vm180_vm12 = vcmp.eq.s32.totalorder %v1168_v42, %v179_v1  ;;  %v175_v5 = vsel %vm169_vm9, %v173_v3, 0.0 }
  0x22   :  { %v174_v37 = vsel %vm168_vm11, %v173_v3, 0.0 }
  0x23   :  { %950 = vmatmul.mubr.msk.f32.gmra.mrb[2].mxu1 %vm82_vm0, %v232_v27  ;;  %939 = vmatprep.subr.mxu0 %v79_v9  ;;  %v539_v17 = vfloor.f32 %v538_v16 }
  0x24   :  { %960 = vmatprep.mubr.msk.f32.mxu1 %vm372_vm2, %v366_v13  ;;  %940 = vmatpush3.msra.mxu0 %v79_v9 }
  0x25   :  { %942 = vmatmul.mubr.msk.f32.vlgmr.msra.gmra.mrb[0].mxu0 %vm82_vm0, %v81_v11  ;;  %v1045_v18 = vtrunc.f32 %v539_v17 }
  0x27   :  { %v1219_v19 = vcvt.f32.s32 %v1045_v18 }
  0x29   :  { %v541_v20 = vadd.s32 1, %v1219_v19  ;;  %v548_v23 = vcvt.s32.f32 %v1219_v19  ;;  %v553_v27 = vrot.slane %v1219_v19, %v1130_v12  ;;  %v716_v57 = vrot.slane %v1219_v19, %v1152_v31 }
  0x2b   :  { %vm542_vm3 = vcmp.gt.s32.totalorder %v541_v20, 0  ;;  %v1226_v25 = vsub.f32 %v536_v14, %v548_v23  ;;  %vm554_vm5 = vcmp.eq.s32.totalorder %v1127_v8, %v553_v27  ;;  %vm555_vm6 = vcmp.eq.s32.totalorder %v1155_v32, %v553_v27 }
  0x2c   :  { %v543_v21 = vsel %vm542_vm3, %v541_v20, 0  ;;  %vm718_vm13 = vcmp.eq.s32.totalorder %v1159_v36, %v716_v57  ;;  %vm717_vm15 = vcmp.eq.s32.totalorder %v1168_v42, %v716_v57  ;;  %v34_v23 = vadd.s32 40, %v1127_v8 }
  0x2d   :  { %vm544_vm4 = vcmp.lt.s32.totalorder %v543_v21, 15  ;;  %v571_v28 = vrot.slane %v1226_v25, %v1130_v12  ;;  %v752_v10 = vrot.slane %v1226_v25, %v1152_v31 }
  0x2e   :  { %v1222_v22 = vsel %vm544_vm4, %v543_v21, 15  ;;  %vm719_vm4 = vcmp.eq.s32.totalorder %v1185_v56, %v716_v57 }
  0x2f   :  { %v546_v24 = vcvt.s32.f32 %v1222_v22  ;;  %v565_v26 = vrot.slane %v1222_v22, %v1130_v12  ;;  %v740_v2 = vrot.slane %v1222_v22, %v1152_v31 }
  0x31   :  { %v1228_v0 = vsub.f32 %v546_v24, %v536_v14  ;;  %vm566_vm0 = vcmp.eq.s32.totalorder %v1127_v8, %v565_v26  ;;  %vm567_vm7 = vcmp.eq.s32.totalorder %v1155_v32, %v565_v26  ;;  %vm742_vm14 = vcmp.eq.s32.totalorder %v1159_v36, %v740_v2 }
  0x32   :  { %v572_v33 = vsel %vm566_vm0, %v571_v28, 0.0  ;;  %v573_v40 = vsel %vm567_vm7, %v571_v28, 0.0  ;;  %v754_v18 = vsel %vm742_vm14, %v752_v10, 0.0  ;;  %vm741_vm1 = vcmp.eq.s32.totalorder %v1168_v42, %v740_v2 }
  0x33   :  { %v559_v29 = vrot.slane %v1228_v0, %v1130_v12  ;;  %v753_v22 = vsel %vm741_vm1, %v752_v10, 0.0  ;;  %vm744_vm3 = vcmp.eq.s32.totalorder %v1177_v49, %v740_v2  ;;  %vm743_vm0 = vcmp.eq.s32.totalorder %v1185_v56, %v740_v2  ;;  %v191_v56 = vld [vmem:[%s1344_s4 + $0x8] sm:$0xff] }
  0x34   :  { %v756_v24 = vsel %vm744_vm3, %v752_v10, 0.0  ;;  %v755_v42 = vsel %vm743_vm0, %v752_v10, 0.0  ;;  %v42_v26 = vshra.s32 %v34_v23, 2  ;;  %v33_v28 = vadd.s32 32, %v1127_v8 }
  0x35   :  { %v560_v38 = vsel %vm554_vm5, %v559_v29, 0.0  ;;  %v561_v39 = vsel %vm555_vm6, %v559_v29, 0.0  ;;  %v36_v29 = vadd.s32 56, %v1127_v8 }
  0x36   :  { %v574_v44 = vadd.f32 %v572_v33, %v560_v38  ;;  %v575_v45 = vadd.f32 %v573_v40, %v561_v39  ;;  %vm722_vm5 = vcmp.eq.s32.totalorder %v42_v26, %v716_v57  ;;  %vm746_vm6 = vcmp.eq.s32.totalorder %v42_v26, %v740_v2 }
  0x37   :  { %v758_v33 = vsel %vm746_vm6, %v752_v10, 0.0  ;;  %v44_v39 = vshra.s32 %v36_v29, 2 }
  0x38   :  { %v1017_v52 = vpack.c.bf16 %v575_v45, %v574_v44 }
  0x39   :  { %vm748_vm11 = vcmp.eq.s32.totalorder %v44_v39, %v740_v2 }
  0x3a   :  { %v760_v45 = vsel %vm748_vm11, %v752_v10, 0.0 }
  0xf2   :  { %v948_v30 = vpop.f32.mrb[0].mxu1 }
  0xf3   :  { %v369_v34 = vmul.f32 %v948_v30, %v1175_v46  ;;  %v311_v35 = vpop.f32.mrb[1].mxu1  ;;  %v367_v46 = vld [vmem:[%s1345_s5 + $0x8] sm:$0xff] }
  0xf4   :  { %v368_v41 = vmul.f32 %v1179_v50, %v311_v35  ;;  %v576_v50 = vld [vmem:[%s1343_s3] sm:$0xff]  ;;  %v35_v35 = vadd.s32 48, %v1127_v8 }
  0xf6   :  { %v1005_v43 = vpack.c.bf16 %v369_v34, %v368_v41  ;;  %v951_v12 = vpop.f32.mrb[2].mxu1  ;;  %v41_v34 = vshra.s32 %v33_v28, 2  ;;  %v43_v40 = vshra.s32 %v35_v35, 2 }
  0xf7   :  { %v371_v47 = vmul.f32 %v951_v12, %v365_v58  ;;  %v321_v48 = vpop.f32.mrb[3].mxu1  ;;  %v580_v58 = vld [vmem:[%s1343_s3 + $0x20] sm:$0xff] }
  0xf8   :  { %v370_v51 = vmul.f32 %v364_v4, %v321_v48  ;;  %1006 = vmatprep.subr.bf16.mxu1 %v1005_v43  ;;  %v185_v4 = vrot.slane %v1190_v60, %v1152_v31  ;;  %v728_v60 = vrot.slane %v1228_v0, %v1152_v31  ;;  %v943_v13 = vpop.f32.mrb[0].mxu0  ;;  %vm721_vm7 = vcmp.eq.s32.totalorder %v41_v34, %v716_v57 }
  0xf9   :  { %1008 = vmatpush3.bf16.msra.mxu1 %v1005_v43  ;;  %v155_v15 = vpop.f32.mrb[1].mxu0  ;;  %vm745_vm9 = vcmp.eq.s32.totalorder %v41_v34, %v740_v2 }
  0xfa   :  { %v1009_v32 = vpack.c.bf16 %v371_v47, %v370_v51  ;;  %v187_v6 = vsel %vm181_vm10, %v185_v4, 0.0  ;;  %v186_v7 = vsel %vm180_vm12, %v185_v4, 0.0  ;;  %v730_v17 = vsel %vm718_vm13, %v728_v60, 0.0 }
  0xfb   :  { %v189_v9 = vadd.f32 %v187_v6, %v175_v5  ;;  %v188_v11 = vadd.f32 %v186_v7, %v174_v37  ;;  %v762_v19 = vadd.f32 %v754_v18, %v730_v17  ;;  %v729_v20 = vsel %vm717_vm15, %v728_v60, 0.0 }
  0xfc   :  { %1010 = vmatprep.subr.bf16.mxu1 %v1009_v32  ;;  %v761_v31 = vadd.f32 %v753_v22, %v729_v20  ;;  %v731_v0 = vsel %vm719_vm4, %v728_v60, 0.0  ;;  %v734_v30 = vsel %vm722_vm5, %v728_v60, 0.0  ;;  %v733_v41 = vsel %vm721_vm7, %v728_v60, 0.0 }
  0xfd   :  { %1012 = vmatpush3.bf16.msra.mxu1 %v1009_v32  ;;  %v193_v14 = vmul.f32 %v943_v13, %v189_v9  ;;  %v192_v16 = vmul.f32 %v188_v11, %v155_v15  ;;  %v763_v27 = vadd.f32 %v755_v42, %v731_v0  ;;  %v766_v38 = vadd.f32 %v758_v33, %v734_v30  ;;  %v769_v32 = vld [vmem:[%s1346_s6] sm:$0xff] }
  0xfe   :  { %1018 = vmatprep.subr.bf16.mxu1 %v1017_v52  ;;  %v757_v43 = vsel %vm745_vm9, %v752_v10, 0.0  ;;  %vm724_vm10 = vcmp.eq.s32.totalorder %v44_v39, %v716_v57  ;;  %vm723_vm12 = vcmp.eq.s32.totalorder %v43_v40, %v716_v57  ;;  %vm747_vm13 = vcmp.eq.s32.totalorder %v43_v40, %v740_v2 }
  0xff   :  { %v1013_v21 = vpack.c.bf16 %v193_v14, %v192_v16  ;;  %v765_v12 = vadd.f32 %v757_v43, %v733_v41  ;;  %v736_v44 = vsel %vm724_vm10, %v728_v60, 0.0  ;;  %v735_v48 = vsel %vm723_vm12, %v728_v60, 0.0 }
 0x100   :  { %961 = vmatmul.mubr.msk.f32.vlgmr.msra.gmra.mrb[4].mxu1 %vm372_vm2, %v367_v46  ;;  %vm720_vm2 = vcmp.eq.s32.totalorder %v1177_v49, %v716_v57  ;;  %v190_v49 = vld [vmem:[%s1344_s4] sm:$0xff]  ;;  %v768_v47 = vadd.f32 %v760_v45, %v736_v44  ;;  %v759_v51 = vsel %vm747_vm13, %v752_v10, 0.0  ;;  %v770_v10 = vld [vmem:[%s1346_s6 + $0x8] sm:$0xff] }
 0x101   :  { %1020 = vmatpush3.bf16.msra.mxu1 %v1017_v52  ;;  %974 = vmatprep.mubr.msk.f32.mxu1 %vm454_vm8, %v576_v50  ;;  %v732_v36 = vsel %vm720_vm2, %v728_v60, 0.0  ;;  %v767_v8 = vadd.f32 %v759_v51, %v735_v48 }
 0x102   :  { %1014 = vmatprep.subr.bf16.mxu0 %v1013_v21  ;;  %v764_v25 = vadd.f32 %v756_v24, %v732_v36  ;;  %967 = vmatprep.mubr.msk.f32.mxu0 %vm454_vm8, %v190_v49 }
 0x103   :  { %1016 = vmatpush3.bf16.msra.mxu0 %v1013_v21 }
 0x104   :  { %975 = vmatmul.mubr.msk.f32.vlgmr.msra.gmra.mrb[6].mxu1 %vm454_vm8, %v577_v53 }
 0x105   :  { %977 = vmatprep.mubr.msk.f32.mxu1 %vm454_vm8, %v578_v54 }
 0x106   :  { %968 = vmatmul.mubr.msk.f32.vlgmr.msra.gmra.mrb[2].mxu0 %vm454_vm8, %v191_v56 }
 0x108   :  { %978 = vmatmul.mubr.msk.f32.gmra.mrb[8].mxu1 %vm454_vm8, %v579_v55 }
 0x109   :  { %980 = vmatprep.mubr.msk.f32.mxu1 %vm454_vm8, %v580_v58 }
 0x10c   :  { %981 = vmatmul.mubr.msk.f32.gmra.mrb[10].mxu1 %vm454_vm8, %v581_v59 }
 0x10d   :  { %983 = vmatprep.mubr.msk.f32.mxu1 %vm454_vm8, %v582_v61 }
 0x110   :  { %984 = vmatmul.mubr.msk.f32.gmra.mrb[12].mxu1 %vm454_vm8, %v583_v62  ;;  %vm779_vm8 = vcmask 523264  }
 0x111   :  { %1002 = vmatprep.mubr.msk.f32.mxu0 %vm779_vm8, %v769_v32 }
 0x1d3   :  { %v962_v52 = vpop.f32.mrb[4].mxu1 }
 0x1d4   :  { %v445_v46 = vpop.f32.mrb[5].mxu1 }
 0x1d7   :  { %v976_v50 = vpop.f32.mrb[6].mxu1 }
 0x1d8   :  { %v772_v53 = vmul.f32 %v976_v50, %v762_v19  ;;  %v674_v54 = vpop.f32.mrb[7].mxu1 }
 0x1d9   :  { %v771_v55 = vmul.f32 %v761_v31, %v674_v54 }
 0x1db   :  { %v1021_v58 = vpack.c.bf16 %v772_v53, %v771_v55  ;;  %v979_v59 = vpop.f32.mrb[8].mxu1 }
 0x1dc   :  { %v774_v61 = vmul.f32 %v979_v59, %v764_v25  ;;  %v684_v62 = vpop.f32.mrb[9].mxu1 }
 0x1dd   :  { %v773_v63 = vmul.f32 %v763_v27, %v684_v62  ;;  %1022 = vmatprep.subr.bf16.mxu0 %v1021_v58 }
 0x1de   :  { %1024 = vmatpush3.bf16.msra.mxu0 %v1021_v58 }
 0x1df   :  { %v1025_v1 = vpack.c.bf16 %v774_v61, %v773_v63  ;;  %v982_v3 = vpop.f32.mrb[10].mxu1 }
 0x1e0   :  { %v776_v4 = vmul.f32 %v982_v3, %v766_v38  ;;  %v694_v5 = vpop.f32.mrb[11].mxu1 }
 0x1e1   :  { %v775_v6 = vmul.f32 %v765_v12, %v694_v5  ;;  %1026 = vmatprep.subr.bf16.mxu0 %v1025_v1 }
 0x1e2   :  { %1028 = vmatpush3.bf16.msra.mxu0 %v1025_v1 }
 0x1e3   :  { %v1029_v37 = vpack.c.bf16 %v776_v4, %v775_v6  ;;  %v985_v7 = vpop.f32.mrb[12].mxu1 }
 0x1e4   :  { %v778_v57 = vmul.f32 %v985_v7, %v768_v47  ;;  %v704_v2 = vpop.f32.mrb[13].mxu1 }
 0x1e5   :  { %v777_v9 = vmul.f32 %v767_v8, %v704_v2  ;;  %1030 = vmatprep.subr.bf16.mxu0 %v1029_v37 }
 0x1e6   :  { %1032 = vmatpush3.bf16.msra.mxu0 %v1029_v37 }
 0x1e7   :  { %v1033_v60 = vpack.c.bf16 %v778_v57, %v777_v9 }
 0x1e9   :  { %1034 = vmatprep.subr.bf16.mxu0 %v1033_v60 }
 0x1ea   :  { %1036 = vmatpush3.bf16.msra.mxu0 %v1033_v60 }
 0x1ed   :  { %1003 = vmatmul.mubr.msk.f32.vlgmr.msra.gmra.mrb[2].mxu0 %vm779_vm8, %v770_v10 }
 0x2c0   :  { %v1004_v11 = vpop.f32.mrb[2].mxu0 }
 0x2c1   :  { %v1037_v13 = vadd.f32 %v1004_v11, %v962_v52  ;;  %v852_v14 = vpop.f32.mrb[3].mxu0 }
 0x2c2   :  { %v1038_v15 = vadd.f32 %v852_v14, %v445_v46 }
 0x2c3   :  { %864 = vst [vmem:[#allocation2 + $0x8] sm:$0xff] %v1037_v13 }
 0x2c4   :  { %863 = vst [vmem:[#allocation2] sm:$0xff] %v1038_v15 }
 0x2c5   :  { %1061 = shalt.err (!%p1058_p4)
}
 0x2c6   :  { %s1062_s15 = scalar_lea.hbm %s1347_s7, 256 }
 0x2c7   :  { %p1063_p5 = scmp.ne.s32.totalorder %s1347_s7, %s1062_s15  ;;  %p1066_p6 = scmp.lt.u32.totalorder %s1062_s15, %s1347_s7 }
 0x2c9   :  { %p1068_p7 = pnand %p1066_p6, %p1063_p5 }
 0x2cb   :  { %1071 = shalt.err (!%p1068_p7)
}
 0x2cc   :  { %s1075_s20 = smov 128   ;;  %s1076_s21 = smov 8  }
 0x2cd   :  { %876 = dma.vmem_to_hbm [thread:$0]  %s871_s13, 256, %s1347_s7, [#allocation3], %s1075_s20, %s1075_s20, %s1076_s21  }
 0x2ce   :  { %1072 = dma.done.wait [#allocation3], 256  }
 0x2cf   :  { %1073 = vsyncadd [#allocation3], 4294967040 }
 0x2d0   :  { %880 = vsyncpa [#allocation3], 1 }

</bundles_post_ra>
